<compile_context>
chip_gen: v5e
topology: v5e:2x2
jax: 0.10.0
libtpu: 0.0.40
codegen_flags: <defaults>
</compile_context>

<pallas_src>
import functools
import math

import jax
import jax.numpy as jnp
from jax.experimental import pallas as pl
from jax.experimental.pallas import tpu as pltpu


# ----------------------------- kernel helpers ------------------------------ #

def _linear_packed(x, wb_ref, d_in):
    """y = x @ W + b, with W (d_in, d_out) and b (1, d_out) packed row-wise
    into wb_ref = concat([W, b], axis=0) of shape (d_in + 1, d_out)."""
    wb = wb_ref[...]
    return (jnp.dot(x, wb[:d_in, :], preferred_element_type=jnp.float32)
            + wb[d_in:d_in + 1, :])


def _attention(xf, qkv_ref, num_heads, batch, seq):
    """Self-attention on flattened activations.

    xf: (batch*seq, D).  qkv_ref: (D+1, 3D) packed [Wq|Wk|Wv ; bq|bk|bv].
    Attention is computed per batch element over its own `seq` rows; heads are
    contiguous dh-wide column groups.  All (batch, head) score and PV matmuls
    are issued as two batched dot_generals.
    """
    _, dim = xf.shape
    dh = dim // num_heads
    scale = 1.0 / math.sqrt(dh)

    qkv = _linear_packed(xf, qkv_ref, dim)                   # (T, 3D), 1 matmul
    q = qkv[:, :dim]
    k = qkv[:, dim:2 * dim]
    v = qkv[:, 2 * dim:3 * dim]

    def gather(t):
        # (batch*num_heads, seq, dh) built from static 2-D slices stacked along
        # a new LEADING dim only (no lane<->sublane reshape needed).
        tiles = [t[b * seq:(b + 1) * seq, h * dh:(h + 1) * dh]
                 for b in range(batch) for h in range(num_heads)]
        return jnp.stack(tiles, axis=0)

    qh, kh, vh = gather(q), gather(k), gather(v)

    scores = jax.lax.dot_general(                            # (B*H, S, S)
        qh, kh, (((2,), (2,)), ((0,), (0,))),
        preferred_element_type=jnp.float32) * scale
    scores = scores - jnp.max(scores, axis=-1, keepdims=True)
    probs = jnp.exp(scores)
    probs = probs * pl.reciprocal(jnp.sum(probs, axis=-1, keepdims=True),
                                  approx=True)
    ctx = jax.lax.dot_general(                               # (B*H, S, dh)
        probs, vh, (((2,), (1,)), ((0,), (0,))),
        preferred_element_type=jnp.float32)

    rows = []
    for b in range(batch):
        heads = [ctx[b * num_heads + h] for h in range(num_heads)]
        rows.append(heads[0] if num_heads == 1
                    else jnp.concatenate(heads, axis=-1))     # (S, D)
    return rows[0] if batch == 1 else jnp.concatenate(rows, axis=0)   # (T, D)


def _text_encoder_kernel(num_heads, batch, seq, dim,
                         x_ref, qkv1_ref, ln_ref, ffn1_ref, ffn2_ref, qkv2_ref,
                         o_ref):
    x = x_ref[...]                                            # (B*S, D)
    if x.dtype != jnp.float32:
        x = x.astype(jnp.float32)

    # multiHeadAttention
    inter = _attention(x, qkv1_ref, num_heads, batch, seq)

    # layernorm(inter + input)   (nn.LayerNorm: eps=1e-5, biased variance)
    res = inter + x
    mean = jnp.mean(res, axis=-1, keepdims=True)
    var = jnp.mean((res - mean) ** 2, axis=-1, keepdims=True)
    new = ((res - mean) * jax.lax.rsqrt(var + 1e-5)
           * ln_ref[0:1, :] + ln_ref[1:2, :])

    # FFN = Linear -> ReLU -> Linear
    hid = jnp.maximum(_linear_packed(new, ffn1_ref, dim), 0.0)
    ffn = _linear_packed(hid, ffn2_ref, dim)

    # final single-head classicAttention
    out = _attention(ffn, qkv2_ref, 1, batch, seq)

    o_ref[...] = out if out.dtype == o_ref.dtype else out.astype(o_ref.dtype)


# ------------------------------- wrapper ----------------------------------- #

def _pack_params(params):
    (wq1, bq1, wk1, bk1, wv1, bv1, ln_g, ln_b,
     w1, b1, w2, b2, wq2, bq2, wk2, bk2, wv2, bv2) = params
    qkv1 = jnp.concatenate([jnp.concatenate([wq1, wk1, wv1], axis=1),
                            jnp.concatenate([bq1, bk1, bv1], axis=1)], axis=0)
    qkv2 = jnp.concatenate([jnp.concatenate([wq2, wk2, wv2], axis=1),
                            jnp.concatenate([bq2, bk2, bv2], axis=1)], axis=0)
    ln = jnp.concatenate([ln_g, ln_b], axis=0)                # (2, D)
    ffn1 = jnp.concatenate([w1, b1], axis=0)                  # (D+1, D)
    ffn2 = jnp.concatenate([w2, b2], axis=0)                  # (D+1, D)
    return qkv1, ln, ffn1, ffn2, qkv2


@functools.partial(jax.jit, static_argnums=(2,))
def text_encoder_forward(x, params, num_heads):
    B, S, D = x.shape
    qkv1, ln, ffn1, ffn2, qkv2 = _pack_params(params)
    kernel = functools.partial(_text_encoder_kernel, num_heads, B, S, D)
    out = pl.pallas_call(
        kernel,
        out_shape=jax.ShapeDtypeStruct((B * S, D), x.dtype),
        # No grid / no BlockSpecs: every operand is passed whole and resident
        # in VMEM for a single kernel invocation (avoids per-step overhead).
        compiler_params=pltpu.CompilerParams(
            vmem_limit_bytes=32 * 1024 * 1024),
    )(x.reshape(B * S, D), qkv1, ln, ffn1, ffn2, qkv2)
    return out.reshape(B, S, D)


# ------------------------- pure-JAX reference ------------------------------ #

def _ref_forward(x, params, num_heads):
    (wq1, bq1, wk1, bk1, wv1, bv1, ln_g, ln_b,
     w1, b1, w2, b2, wq2, bq2, wk2, bk2, wv2, bv2) = params
    hp = jax.lax.Precision.HIGHEST

    def lin(v, w, b):
        return jnp.einsum("bsd,de->bse", v, w, precision=hp) + b

    def attn(v, wq, bq, wk, bk, wv, bv, H):
        B, S, D = v.shape
        dh = D // H
        q = lin(v, wq, bq).reshape(B, S, H, dh)
        k = lin(v, wk, bk).reshape(B, S, H, dh)
        val = lin(v, wv, bv).reshape(B, S, H, dh)
        s = jnp.einsum("bqhd,bkhd->bhqk", q, k, precision=hp) / math.sqrt(dh)
        p = jax.nn.softmax(s, axis=-1)
        o = jnp.einsum("bhqk,bkhd->bqhd", p, val, precision=hp)
        return o.reshape(B, S, D)

    inter = attn(x, wq1, bq1, wk1, bk1, wv1, bv1, num_heads)
    res = inter + x
    mean = res.mean(-1, keepdims=True)
    var = ((res - mean) ** 2).mean(-1, keepdims=True)
    new = (res - mean) / jnp.sqrt(var + 1e-5) * ln_g + ln_b
    hid = jnp.maximum(lin(new, w1, b1), 0.0)
    ffn = lin(hid, w2, b2)
    return attn(ffn, wq2, bq2, wk2, bk2, wv2, bv2, 1)


# --------------------------------- main ------------------------------------ #

def _init_params(key, dim):
    bound = 1.0 / math.sqrt(dim)

    def lin_pair(k):
        kw, kb = jax.random.split(k)
        w = jax.random.uniform(kw, (dim, dim), jnp.float32, -bound, bound)
        b = jax.random.uniform(kb, (1, dim), jnp.float32, -bound, bound)
        return w, b

    keys = jax.random.split(key, 8)
    wq1, bq1 = lin_pair(keys[0])
    wk1, bk1 = lin_pair(keys[1])
    wv1, bv1 = lin_pair(keys[2])
    ln_g = jnp.ones((1, dim), jnp.float32)     # nn.LayerNorm default init
    ln_b = jnp.zeros((1, dim), jnp.float32)
    w1, b1 = lin_pair(keys[3])
    w2, b2 = lin_pair(keys[4])
    wq2, bq2 = lin_pair(keys[5])
    wk2, bk2 = lin_pair(keys[6])
    wv2, bv2 = lin_pair(keys[7])
    return [wq1, bq1, wk1, bk1, wv1, bv1, ln_g, ln_b,
            w1, b1, w2, b2, wq2, bq2, wk2, bk2, wv2, bv2]


if __name__ == "__main__":
    B, S, D = 2, 8, 32
    NUM_HEADS = 4

    key = jax.random.PRNGKey(0)
    kx, kp = jax.random.split(key)
    x = jax.random.normal(kx, (B, S, D), jnp.float32)
    params = _init_params(kp, D)

    out = text_encoder_forward(x, params, NUM_HEADS)
    out = jax.block_until_ready(out)

    ref = _ref_forward(x, params, NUM_HEADS)
    assert out.shape == (B, S, D)
    assert bool(jnp.all(jnp.isfinite(out)))
    assert bool(jnp.allclose(out, ref, rtol=5e-3, atol=5e-3)), \
        f"max abs diff {float(jnp.max(jnp.abs(out - ref)))}"

    print("KERNEL_OK")
</pallas_src>

<mosaic_0001>
module attributes {stable_mosaic.version = 11 : i64} {
  func.func @_text_encoder_kernel(%arg0: memref<16x32xf32, #tpu.memory_space<vmem>>, %arg1: memref<33x96xf32, #tpu.memory_space<vmem>>, %arg2: memref<2x32xf32, #tpu.memory_space<vmem>>, %arg3: memref<33x32xf32, #tpu.memory_space<vmem>>, %arg4: memref<33x32xf32, #tpu.memory_space<vmem>>, %arg5: memref<33x96xf32, #tpu.memory_space<vmem>>, %arg6: memref<16x32xf32, #tpu.memory_space<vmem>>) attributes {dimension_semantics = [], scalar_prefetch = 0 : i64, scratch_operands = 0 : i64, tpu.core_type = #tpu.core_type<tc>} {
    %c0 = arith.constant 0 : index
    %c0_0 = arith.constant 0 : index
    %0 = vector.load %arg0[%c0, %c0_0] : memref<16x32xf32, #tpu.memory_space<vmem>>, vector<16x32xf32>
    %c0_1 = arith.constant 0 : index
    %c0_2 = arith.constant 0 : index
    %1 = vector.load %arg1[%c0_1, %c0_2] : memref<33x96xf32, #tpu.memory_space<vmem>>, vector<33x96xf32>
    %2 = vector.extract_strided_slice %1 {offsets = [0, 0], sizes = [32, 96], strides = [1, 1]} : vector<33x96xf32> to vector<32x96xf32>
    %cst = arith.constant dense<0.000000e+00> : vector<16x96xf32>
    %3 = tpu.matmul %0, %2, %cst {dimension_numbers = #tpu.dot_dimension_numbers<[1], [0], [0], [1], [0, 0, 1, 1], [], []>} : vector<16x32xf32>, vector<32x96xf32>, vector<16x96xf32> -> vector<16x96xf32>
    %4 = vector.extract_strided_slice %1 {offsets = [32, 0], sizes = [1, 96], strides = [1, 1]} : vector<33x96xf32> to vector<1x96xf32>
    %5 = vector.broadcast %4 : vector<1x96xf32> to vector<16x96xf32>
    %6 = arith.addf %3, %5 : vector<16x96xf32>
    %7 = vector.extract_strided_slice %6 {offsets = [0, 0], sizes = [16, 32], strides = [1, 1]} : vector<16x96xf32> to vector<16x32xf32>
    %8 = vector.extract_strided_slice %6 {offsets = [0, 32], sizes = [16, 32], strides = [1, 1]} : vector<16x96xf32> to vector<16x32xf32>
    %9 = vector.extract_strided_slice %6 {offsets = [0, 64], sizes = [16, 32], strides = [1, 1]} : vector<16x96xf32> to vector<16x32xf32>
    %10 = vector.extract_strided_slice %7 {offsets = [0, 0], sizes = [8, 8], strides = [1, 1]} : vector<16x32xf32> to vector<8x8xf32>
    %11 = vector.extract_strided_slice %7 {offsets = [0, 8], sizes = [8, 8], strides = [1, 1]} : vector<16x32xf32> to vector<8x8xf32>
    %12 = vector.extract_strided_slice %7 {offsets = [0, 16], sizes = [8, 8], strides = [1, 1]} : vector<16x32xf32> to vector<8x8xf32>
    %13 = vector.extract_strided_slice %7 {offsets = [0, 24], sizes = [8, 8], strides = [1, 1]} : vector<16x32xf32> to vector<8x8xf32>
    %14 = vector.extract_strided_slice %7 {offsets = [8, 0], sizes = [8, 8], strides = [1, 1]} : vector<16x32xf32> to vector<8x8xf32>
    %15 = vector.extract_strided_slice %7 {offsets = [8, 8], sizes = [8, 8], strides = [1, 1]} : vector<16x32xf32> to vector<8x8xf32>
    %16 = vector.extract_strided_slice %7 {offsets = [8, 16], sizes = [8, 8], strides = [1, 1]} : vector<16x32xf32> to vector<8x8xf32>
    %17 = vector.extract_strided_slice %7 {offsets = [8, 24], sizes = [8, 8], strides = [1, 1]} : vector<16x32xf32> to vector<8x8xf32>
    %18 = vector.shape_cast %10 : vector<8x8xf32> to vector<1x8x8xf32>
    %19 = vector.shape_cast %11 : vector<8x8xf32> to vector<1x8x8xf32>
    %20 = vector.shape_cast %12 : vector<8x8xf32> to vector<1x8x8xf32>
    %21 = vector.shape_cast %13 : vector<8x8xf32> to vector<1x8x8xf32>
    %22 = vector.shape_cast %14 : vector<8x8xf32> to vector<1x8x8xf32>
    %23 = vector.shape_cast %15 : vector<8x8xf32> to vector<1x8x8xf32>
    %24 = vector.shape_cast %16 : vector<8x8xf32> to vector<1x8x8xf32>
    %25 = vector.shape_cast %17 : vector<8x8xf32> to vector<1x8x8xf32>
    %26 = tpu.concatenate %18, %19, %20, %21, %22, %23, %24, %25 in 0 : vector<1x8x8xf32>, vector<1x8x8xf32>, vector<1x8x8xf32>, vector<1x8x8xf32>, vector<1x8x8xf32>, vector<1x8x8xf32>, vector<1x8x8xf32>, vector<1x8x8xf32> -> vector<8x8x8xf32>
    %27 = vector.extract_strided_slice %8 {offsets = [0, 0], sizes = [8, 8], strides = [1, 1]} : vector<16x32xf32> to vector<8x8xf32>
    %28 = vector.extract_strided_slice %8 {offsets = [0, 8], sizes = [8, 8], strides = [1, 1]} : vector<16x32xf32> to vector<8x8xf32>
    %29 = vector.extract_strided_slice %8 {offsets = [0, 16], sizes = [8, 8], strides = [1, 1]} : vector<16x32xf32> to vector<8x8xf32>
    %30 = vector.extract_strided_slice %8 {offsets = [0, 24], sizes = [8, 8], strides = [1, 1]} : vector<16x32xf32> to vector<8x8xf32>
    %31 = vector.extract_strided_slice %8 {offsets = [8, 0], sizes = [8, 8], strides = [1, 1]} : vector<16x32xf32> to vector<8x8xf32>
    %32 = vector.extract_strided_slice %8 {offsets = [8, 8], sizes = [8, 8], strides = [1, 1]} : vector<16x32xf32> to vector<8x8xf32>
    %33 = vector.extract_strided_slice %8 {offsets = [8, 16], sizes = [8, 8], strides = [1, 1]} : vector<16x32xf32> to vector<8x8xf32>
    %34 = vector.extract_strided_slice %8 {offsets = [8, 24], sizes = [8, 8], strides = [1, 1]} : vector<16x32xf32> to vector<8x8xf32>
    %35 = vector.shape_cast %27 : vector<8x8xf32> to vector<1x8x8xf32>
    %36 = vector.shape_cast %28 : vector<8x8xf32> to vector<1x8x8xf32>
    %37 = vector.shape_cast %29 : vector<8x8xf32> to vector<1x8x8xf32>
    %38 = vector.shape_cast %30 : vector<8x8xf32> to vector<1x8x8xf32>
    %39 = vector.shape_cast %31 : vector<8x8xf32> to vector<1x8x8xf32>
    %40 = vector.shape_cast %32 : vector<8x8xf32> to vector<1x8x8xf32>
    %41 = vector.shape_cast %33 : vector<8x8xf32> to vector<1x8x8xf32>
    %42 = vector.shape_cast %34 : vector<8x8xf32> to vector<1x8x8xf32>
    %43 = tpu.concatenate %35, %36, %37, %38, %39, %40, %41, %42 in 0 : vector<1x8x8xf32>, vector<1x8x8xf32>, vector<1x8x8xf32>, vector<1x8x8xf32>, vector<1x8x8xf32>, vector<1x8x8xf32>, vector<1x8x8xf32>, vector<1x8x8xf32> -> vector<8x8x8xf32>
    %44 = vector.extract_strided_slice %9 {offsets = [0, 0], sizes = [8, 8], strides = [1, 1]} : vector<16x32xf32> to vector<8x8xf32>
    %45 = vector.extract_strided_slice %9 {offsets = [0, 8], sizes = [8, 8], strides = [1, 1]} : vector<16x32xf32> to vector<8x8xf32>
    %46 = vector.extract_strided_slice %9 {offsets = [0, 16], sizes = [8, 8], strides = [1, 1]} : vector<16x32xf32> to vector<8x8xf32>
    %47 = vector.extract_strided_slice %9 {offsets = [0, 24], sizes = [8, 8], strides = [1, 1]} : vector<16x32xf32> to vector<8x8xf32>
    %48 = vector.extract_strided_slice %9 {offsets = [8, 0], sizes = [8, 8], strides = [1, 1]} : vector<16x32xf32> to vector<8x8xf32>
    %49 = vector.extract_strided_slice %9 {offsets = [8, 8], sizes = [8, 8], strides = [1, 1]} : vector<16x32xf32> to vector<8x8xf32>
    %50 = vector.extract_strided_slice %9 {offsets = [8, 16], sizes = [8, 8], strides = [1, 1]} : vector<16x32xf32> to vector<8x8xf32>
    %51 = vector.extract_strided_slice %9 {offsets = [8, 24], sizes = [8, 8], strides = [1, 1]} : vector<16x32xf32> to vector<8x8xf32>
    %52 = vector.shape_cast %44 : vector<8x8xf32> to vector<1x8x8xf32>
    %53 = vector.shape_cast %45 : vector<8x8xf32> to vector<1x8x8xf32>
    %54 = vector.shape_cast %46 : vector<8x8xf32> to vector<1x8x8xf32>
    %55 = vector.shape_cast %47 : vector<8x8xf32> to vector<1x8x8xf32>
    %56 = vector.shape_cast %48 : vector<8x8xf32> to vector<1x8x8xf32>
    %57 = vector.shape_cast %49 : vector<8x8xf32> to vector<1x8x8xf32>
    %58 = vector.shape_cast %50 : vector<8x8xf32> to vector<1x8x8xf32>
    %59 = vector.shape_cast %51 : vector<8x8xf32> to vector<1x8x8xf32>
    %60 = tpu.concatenate %52, %53, %54, %55, %56, %57, %58, %59 in 0 : vector<1x8x8xf32>, vector<1x8x8xf32>, vector<1x8x8xf32>, vector<1x8x8xf32>, vector<1x8x8xf32>, vector<1x8x8xf32>, vector<1x8x8xf32>, vector<1x8x8xf32> -> vector<8x8x8xf32>
    %cst_3 = arith.constant dense<0.000000e+00> : vector<8x8x8xf32>
    %61 = tpu.matmul %26, %43, %cst_3 {dimension_numbers = #tpu.dot_dimension_numbers<[2], [2], [1], [1], [0, 0, 0, 1, 1, 1], [0], [0]>} : vector<8x8x8xf32>, vector<8x8x8xf32>, vector<8x8x8xf32> -> vector<8x8x8xf32>
    %cst_4 = arith.constant 0.353553385 : f32
    %62 = vector.broadcast %cst_4 : f32 to vector<8x8x8xf32>
    %63 = arith.mulf %61, %62 : vector<8x8x8xf32>
    %cst_5 = arith.constant dense<0xFF800000> : vector<8x8xf32>
    %64 = vector.multi_reduction <maximumf>, %63, %cst_5 [2] : vector<8x8x8xf32> to vector<8x8xf32>
    %65 = vector.shape_cast %64 : vector<8x8xf32> to vector<8x8x1xf32>
    %66 = vector.broadcast %65 : vector<8x8x1xf32> to vector<8x8x8xf32>
    %67 = arith.subf %63, %66 : vector<8x8x8xf32>
    %68 = math.exp %67 : vector<8x8x8xf32>
    %cst_6 = arith.constant dense<0.000000e+00> : vector<8x8xf32>
    %69 = vector.multi_reduction <add>, %68, %cst_6 [2] : vector<8x8x8xf32> to vector<8x8xf32>
    %70 = vector.shape_cast %69 : vector<8x8xf32> to vector<8x8x1xf32>
    %71 = tpu.reciprocal %70 {approx = true} : vector<8x8x1xf32> -> vector<8x8x1xf32>
    %72 = vector.broadcast %71 : vector<8x8x1xf32> to vector<8x8x8xf32>
    %73 = arith.mulf %68, %72 : vector<8x8x8xf32>
    %cst_7 = arith.constant dense<0.000000e+00> : vector<8x8x8xf32>
    %74 = tpu.matmul %73, %60, %cst_7 {dimension_numbers = #tpu.dot_dimension_numbers<[2], [1], [1], [2], [0, 0, 0, 1, 1, 2], [0], [0]>} : vector<8x8x8xf32>, vector<8x8x8xf32>, vector<8x8x8xf32> -> vector<8x8x8xf32>
    %75 = vector.extract_strided_slice %74 {offsets = [0, 0, 0], sizes = [1, 8, 8], strides = [1, 1, 1]} : vector<8x8x8xf32> to vector<1x8x8xf32>
    %76 = vector.shape_cast %75 : vector<1x8x8xf32> to vector<8x8xf32>
    %77 = vector.extract_strided_slice %74 {offsets = [1, 0, 0], sizes = [1, 8, 8], strides = [1, 1, 1]} : vector<8x8x8xf32> to vector<1x8x8xf32>
    %78 = vector.shape_cast %77 : vector<1x8x8xf32> to vector<8x8xf32>
    %79 = vector.extract_strided_slice %74 {offsets = [2, 0, 0], sizes = [1, 8, 8], strides = [1, 1, 1]} : vector<8x8x8xf32> to vector<1x8x8xf32>
    %80 = vector.shape_cast %79 : vector<1x8x8xf32> to vector<8x8xf32>
    %81 = vector.extract_strided_slice %74 {offsets = [3, 0, 0], sizes = [1, 8, 8], strides = [1, 1, 1]} : vector<8x8x8xf32> to vector<1x8x8xf32>
    %82 = vector.shape_cast %81 : vector<1x8x8xf32> to vector<8x8xf32>
    %83 = tpu.concatenate %76, %78, %80, %82 in 1 : vector<8x8xf32>, vector<8x8xf32>, vector<8x8xf32>, vector<8x8xf32> -> vector<8x32xf32>
    %84 = vector.extract_strided_slice %74 {offsets = [4, 0, 0], sizes = [1, 8, 8], strides = [1, 1, 1]} : vector<8x8x8xf32> to vector<1x8x8xf32>
    %85 = vector.shape_cast %84 : vector<1x8x8xf32> to vector<8x8xf32>
    %86 = vector.extract_strided_slice %74 {offsets = [5, 0, 0], sizes = [1, 8, 8], strides = [1, 1, 1]} : vector<8x8x8xf32> to vector<1x8x8xf32>
    %87 = vector.shape_cast %86 : vector<1x8x8xf32> to vector<8x8xf32>
    %88 = vector.extract_strided_slice %74 {offsets = [6, 0, 0], sizes = [1, 8, 8], strides = [1, 1, 1]} : vector<8x8x8xf32> to vector<1x8x8xf32>
    %89 = vector.shape_cast %88 : vector<1x8x8xf32> to vector<8x8xf32>
    %90 = vector.extract_strided_slice %74 {offsets = [7, 0, 0], sizes = [1, 8, 8], strides = [1, 1, 1]} : vector<8x8x8xf32> to vector<1x8x8xf32>
    %91 = vector.shape_cast %90 : vector<1x8x8xf32> to vector<8x8xf32>
    %92 = tpu.concatenate %85, %87, %89, %91 in 1 : vector<8x8xf32>, vector<8x8xf32>, vector<8x8xf32>, vector<8x8xf32> -> vector<8x32xf32>
    %93 = tpu.concatenate %83, %92 in 0 : vector<8x32xf32>, vector<8x32xf32> -> vector<16x32xf32>
    %94 = arith.addf %93, %0 : vector<16x32xf32>
    %cst_8 = arith.constant dense<0.000000e+00> : vector<16xf32>
    %95 = vector.multi_reduction <add>, %94, %cst_8 [1] : vector<16x32xf32> to vector<16xf32>
    %96 = vector.shape_cast %95 : vector<16xf32> to vector<16x1xf32>
    %cst_9 = arith.constant 3.200000e+01 : f32
    %97 = vector.broadcast %cst_9 : f32 to vector<16x1xf32>
    %98 = arith.divf %96, %97 : vector<16x1xf32>
    %99 = vector.broadcast %98 : vector<16x1xf32> to vector<16x32xf32>
    %100 = arith.subf %94, %99 : vector<16x32xf32>
    %101 = arith.mulf %100, %100 : vector<16x32xf32>
    %cst_10 = arith.constant dense<0.000000e+00> : vector<16xf32>
    %102 = vector.multi_reduction <add>, %101, %cst_10 [1] : vector<16x32xf32> to vector<16xf32>
    %103 = vector.shape_cast %102 : vector<16xf32> to vector<16x1xf32>
    %cst_11 = arith.constant 3.200000e+01 : f32
    %104 = vector.broadcast %cst_11 : f32 to vector<16x1xf32>
    %105 = arith.divf %103, %104 : vector<16x1xf32>
    %106 = vector.broadcast %98 : vector<16x1xf32> to vector<16x32xf32>
    %107 = arith.subf %94, %106 : vector<16x32xf32>
    %cst_12 = arith.constant 9.99999974E-6 : f32
    %108 = vector.broadcast %cst_12 : f32 to vector<16x1xf32>
    %109 = arith.addf %105, %108 : vector<16x1xf32>
    %110 = math.rsqrt %109 : vector<16x1xf32>
    %111 = vector.broadcast %110 : vector<16x1xf32> to vector<16x32xf32>
    %112 = arith.mulf %107, %111 : vector<16x32xf32>
    %c0_13 = arith.constant 0 : index
    %c0_14 = arith.constant 0 : index
    %113 = vector.load %arg2[%c0_13, %c0_14] : memref<2x32xf32, #tpu.memory_space<vmem>>, vector<1x32xf32>
    %114 = vector.broadcast %113 : vector<1x32xf32> to vector<16x32xf32>
    %115 = arith.mulf %112, %114 : vector<16x32xf32>
    %c1 = arith.constant 1 : index
    %c0_15 = arith.constant 0 : index
    %116 = vector.load %arg2[%c1, %c0_15] : memref<2x32xf32, #tpu.memory_space<vmem>>, vector<1x32xf32>
    %117 = vector.broadcast %116 : vector<1x32xf32> to vector<16x32xf32>
    %118 = arith.addf %115, %117 : vector<16x32xf32>
    %c0_16 = arith.constant 0 : index
    %c0_17 = arith.constant 0 : index
    %119 = vector.load %arg3[%c0_16, %c0_17] : memref<33x32xf32, #tpu.memory_space<vmem>>, vector<33x32xf32>
    %120 = vector.extract_strided_slice %119 {offsets = [0, 0], sizes = [32, 32], strides = [1, 1]} : vector<33x32xf32> to vector<32x32xf32>
    %cst_18 = arith.constant dense<0.000000e+00> : vector<16x32xf32>
    %121 = tpu.matmul %118, %120, %cst_18 {dimension_numbers = #tpu.dot_dimension_numbers<[1], [0], [0], [1], [0, 0, 1, 1], [], []>} : vector<16x32xf32>, vector<32x32xf32>, vector<16x32xf32> -> vector<16x32xf32>
    %122 = vector.extract_strided_slice %119 {offsets = [32, 0], sizes = [1, 32], strides = [1, 1]} : vector<33x32xf32> to vector<1x32xf32>
    %123 = vector.broadcast %122 : vector<1x32xf32> to vector<16x32xf32>
    %124 = arith.addf %121, %123 : vector<16x32xf32>
    %cst_19 = arith.constant 0.000000e+00 : f32
    %125 = vector.broadcast %cst_19 : f32 to vector<16x32xf32>
    %126 = arith.maximumf %124, %125 : vector<16x32xf32>
    %c0_20 = arith.constant 0 : index
    %c0_21 = arith.constant 0 : index
    %127 = vector.load %arg4[%c0_20, %c0_21] : memref<33x32xf32, #tpu.memory_space<vmem>>, vector<33x32xf32>
    %128 = vector.extract_strided_slice %127 {offsets = [0, 0], sizes = [32, 32], strides = [1, 1]} : vector<33x32xf32> to vector<32x32xf32>
    %cst_22 = arith.constant dense<0.000000e+00> : vector<16x32xf32>
    %129 = tpu.matmul %126, %128, %cst_22 {dimension_numbers = #tpu.dot_dimension_numbers<[1], [0], [0], [1], [0, 0, 1, 1], [], []>} : vector<16x32xf32>, vector<32x32xf32>, vector<16x32xf32> -> vector<16x32xf32>
    %130 = vector.extract_strided_slice %127 {offsets = [32, 0], sizes = [1, 32], strides = [1, 1]} : vector<33x32xf32> to vector<1x32xf32>
    %131 = vector.broadcast %130 : vector<1x32xf32> to vector<16x32xf32>
    %132 = arith.addf %129, %131 : vector<16x32xf32>
    %c0_23 = arith.constant 0 : index
    %c0_24 = arith.constant 0 : index
    %133 = vector.load %arg5[%c0_23, %c0_24] : memref<33x96xf32, #tpu.memory_space<vmem>>, vector<33x96xf32>
    %134 = vector.extract_strided_slice %133 {offsets = [0, 0], sizes = [32, 96], strides = [1, 1]} : vector<33x96xf32> to vector<32x96xf32>
    %cst_25 = arith.constant dense<0.000000e+00> : vector<16x96xf32>
    %135 = tpu.matmul %132, %134, %cst_25 {dimension_numbers = #tpu.dot_dimension_numbers<[1], [0], [0], [1], [0, 0, 1, 1], [], []>} : vector<16x32xf32>, vector<32x96xf32>, vector<16x96xf32> -> vector<16x96xf32>
    %136 = vector.extract_strided_slice %133 {offsets = [32, 0], sizes = [1, 96], strides = [1, 1]} : vector<33x96xf32> to vector<1x96xf32>
    %137 = vector.broadcast %136 : vector<1x96xf32> to vector<16x96xf32>
    %138 = arith.addf %135, %137 : vector<16x96xf32>
    %139 = vector.extract_strided_slice %138 {offsets = [0, 0], sizes = [16, 32], strides = [1, 1]} : vector<16x96xf32> to vector<16x32xf32>
    %140 = vector.extract_strided_slice %138 {offsets = [0, 32], sizes = [16, 32], strides = [1, 1]} : vector<16x96xf32> to vector<16x32xf32>
    %141 = vector.extract_strided_slice %138 {offsets = [0, 64], sizes = [16, 32], strides = [1, 1]} : vector<16x96xf32> to vector<16x32xf32>
    %142 = vector.extract_strided_slice %139 {offsets = [0, 0], sizes = [8, 32], strides = [1, 1]} : vector<16x32xf32> to vector<8x32xf32>
    %143 = vector.extract_strided_slice %139 {offsets = [8, 0], sizes = [8, 32], strides = [1, 1]} : vector<16x32xf32> to vector<8x32xf32>
    %144 = vector.shape_cast %142 : vector<8x32xf32> to vector<1x8x32xf32>
    %145 = vector.shape_cast %143 : vector<8x32xf32> to vector<1x8x32xf32>
    %146 = tpu.concatenate %144, %145 in 0 : vector<1x8x32xf32>, vector<1x8x32xf32> -> vector<2x8x32xf32>
    %147 = vector.extract_strided_slice %140 {offsets = [0, 0], sizes = [8, 32], strides = [1, 1]} : vector<16x32xf32> to vector<8x32xf32>
    %148 = vector.extract_strided_slice %140 {offsets = [8, 0], sizes = [8, 32], strides = [1, 1]} : vector<16x32xf32> to vector<8x32xf32>
    %149 = vector.shape_cast %147 : vector<8x32xf32> to vector<1x8x32xf32>
    %150 = vector.shape_cast %148 : vector<8x32xf32> to vector<1x8x32xf32>
    %151 = tpu.concatenate %149, %150 in 0 : vector<1x8x32xf32>, vector<1x8x32xf32> -> vector<2x8x32xf32>
    %152 = vector.extract_strided_slice %141 {offsets = [0, 0], sizes = [8, 32], strides = [1, 1]} : vector<16x32xf32> to vector<8x32xf32>
    %153 = vector.extract_strided_slice %141 {offsets = [8, 0], sizes = [8, 32], strides = [1, 1]} : vector<16x32xf32> to vector<8x32xf32>
    %154 = vector.shape_cast %152 : vector<8x32xf32> to vector<1x8x32xf32>
    %155 = vector.shape_cast %153 : vector<8x32xf32> to vector<1x8x32xf32>
    %156 = tpu.concatenate %154, %155 in 0 : vector<1x8x32xf32>, vector<1x8x32xf32> -> vector<2x8x32xf32>
    %cst_26 = arith.constant dense<0.000000e+00> : vector<2x8x8xf32>
    %157 = tpu.matmul %146, %151, %cst_26 {dimension_numbers = #tpu.dot_dimension_numbers<[2], [2], [1], [1], [0, 0, 0, 1, 1, 1], [0], [0]>} : vector<2x8x32xf32>, vector<2x8x32xf32>, vector<2x8x8xf32> -> vector<2x8x8xf32>
    %cst_27 = arith.constant 0.176776692 : f32
    %158 = vector.broadcast %cst_27 : f32 to vector<2x8x8xf32>
    %159 = arith.mulf %157, %158 : vector<2x8x8xf32>
    %cst_28 = arith.constant dense<0xFF800000> : vector<2x8xf32>
    %160 = vector.multi_reduction <maximumf>, %159, %cst_28 [2] : vector<2x8x8xf32> to vector<2x8xf32>
    %161 = vector.shape_cast %160 : vector<2x8xf32> to vector<2x8x1xf32>
    %162 = vector.broadcast %161 : vector<2x8x1xf32> to vector<2x8x8xf32>
    %163 = arith.subf %159, %162 : vector<2x8x8xf32>
    %164 = math.exp %163 : vector<2x8x8xf32>
    %cst_29 = arith.constant dense<0.000000e+00> : vector<2x8xf32>
    %165 = vector.multi_reduction <add>, %164, %cst_29 [2] : vector<2x8x8xf32> to vector<2x8xf32>
    %166 = vector.shape_cast %165 : vector<2x8xf32> to vector<2x8x1xf32>
    %167 = tpu.reciprocal %166 {approx = true} : vector<2x8x1xf32> -> vector<2x8x1xf32>
    %168 = vector.broadcast %167 : vector<2x8x1xf32> to vector<2x8x8xf32>
    %169 = arith.mulf %164, %168 : vector<2x8x8xf32>
    %cst_30 = arith.constant dense<0.000000e+00> : vector<2x8x32xf32>
    %170 = tpu.matmul %169, %156, %cst_30 {dimension_numbers = #tpu.dot_dimension_numbers<[2], [1], [1], [2], [0, 0, 0, 1, 1, 2], [0], [0]>} : vector<2x8x8xf32>, vector<2x8x32xf32>, vector<2x8x32xf32> -> vector<2x8x32xf32>
    %171 = vector.extract_strided_slice %170 {offsets = [0, 0, 0], sizes = [1, 8, 32], strides = [1, 1, 1]} : vector<2x8x32xf32> to vector<1x8x32xf32>
    %172 = vector.shape_cast %171 : vector<1x8x32xf32> to vector<8x32xf32>
    %173 = vector.extract_strided_slice %170 {offsets = [1, 0, 0], sizes = [1, 8, 32], strides = [1, 1, 1]} : vector<2x8x32xf32> to vector<1x8x32xf32>
    %174 = vector.shape_cast %173 : vector<1x8x32xf32> to vector<8x32xf32>
    %175 = tpu.concatenate %172, %174 in 0 : vector<8x32xf32>, vector<8x32xf32> -> vector<16x32xf32>
    %c0_31 = arith.constant 0 : index
    %c0_32 = arith.constant 0 : index
    %176 = vector.load %arg6[%c0_31, %c0_32] : memref<16x32xf32, #tpu.memory_space<vmem>>, vector<16x32xf32>
    tpu.vector_store %arg6[%c0_31, %c0_32], %175 {strides = array<i32>} : memref<16x32xf32, #tpu.memory_space<vmem>>, vector<16x32xf32>,
    return
  }
}

</mosaic_0001>

<bundles_post_ra>
// kernel: text_encoder_forward.1
= control target key start
LH: loop header
LB: loop body
LE: loop exit
PB: predicated region body
PF: predicated region fallthrough
CT: control target
= control target key end

     0   :  { %s1368_s0 = inlined_call_operand.vmem [shape: f32[16,32], index: 0, kind: input, shape index: {}]   ;;  %s1369_s1 = inlined_call_operand.vmem [shape: f32[33,96], index: 1, kind: input, shape index: {}]   ;;  %s1370_s2 = inlined_call_operand.vmem [shape: f32[2,32], index: 2, kind: input, shape index: {}]   ;;  %s1371_s3 = inlined_call_operand.vmem [shape: f32[33,32], index: 3, kind: input, shape index: {}]   ;;  %s1372_s4 = inlined_call_operand.vmem [shape: f32[33,32], index: 4, kind: input, shape index: {}]   ;;  %s1373_s5 = inlined_call_operand.vmem [shape: f32[33,96], index: 5, kind: input, shape index: {}]   ;;  %s1374_s6 = inlined_call_operand.hbm [shape: f32[16,32], index: 6, kind: output, shape index: {}]  }
   0x1   :  { %v29_v0 = vld [vmem:[%s1369_s1 + $0x18] sm:$0xff]  ;;  %v28_v1 = vld [vmem:[%s1369_s1 + $0x10] sm:$0xff]  ;;  %v27_v2 = vld [vmem:[%s1369_s1 + $0x8] sm:$0xff] }
   0x2   :  { %51 = vmatpush.msra.mxu0 %v29_v0  ;;  %v26_v3 = vld [vmem:[%s1369_s1] sm:$0xff] }
   0x4   :  { %52 = vmatpush.msra.mxu0 %v28_v1 }
   0x5   :  { %11 = vsyncpa [#allocation3], 0  ;;  %v1142_v4 = vld [vmem:[%s1368_s0] sm:$0xff]  ;;  %vm32_vm0 = vcmask 261120   ;;  %v1149_v5 = vld [vmem:[%s1368_s0 + $0x8] sm:$0xff]  ;;  %s1081_s11 = smov 104  }
   0x6   :  { %53 = vmatpush.msra.mxu0 %v27_v2  ;;  %v1003_v6 = vld [vmem:[%s1369_s1 + $0x20] ss:$0 sm:$0xff]  ;;  %s1082_s12 = smov 120   ;;  %s1083_s0 = smov 112   ;;  %vm78_vm1 = vcmask 64512   ;;  %vm602_vm2 = vcmask 130048  }
   0x7   :  { %s1084_s1 = smov 96   ;;  %s1085_s13 = smov 64   ;;  %vm604_vm3 = vcmask 195584  }
   0x8   :  { %54 = vmatpush.msra.mxu0 %v26_v3  ;;  %s1086_s14 = smov 8   ;;  %s1087_s15 = smov 24  }
   0x9   :  { %939 = vmatmul.msk.f32.vlgmr.msra.gmra.mxu0 %vm32_vm0, %v1142_v4  ;;  %s1088_s16 = smov 16   ;;  %s927_s26 = sshll.u32 %s1374_s6, 4  ;;  %s928_s26 = int_to_ptr.hbm [resolvable:$true] %s927_s26 }
   0xa   :  { %s1091_s27 = smov 128  }
  0x11   :  { %940 = vmatmul.msk.f32.gmra.mxu0 %vm32_vm0, %v1149_v5 }
  0x86   :  { %v56_v7 = vpop.f32.mrf.mxu0 }
  0x87   :  { %v1156_v8 = vadd.f32 %v1003_v6, %v56_v7 }
  0x89   :  { %67 = vrot.lane.b32.xlu1 %v1156_v8, %s1081_s11  ;;  %63 = vrot.lane.b32.xlu0 %v1156_v8, %s1082_s12 }
  0x8e   :  { %v59_v9 = vpop.f32.mrf.mxu0 }
  0x8f   :  { %v1160_v10 = vadd.f32 %v1003_v6, %v59_v9 }
  0x91   :  { %74 = vrot.lane.b32.xlu1 %v1160_v10, %s1081_s11  ;;  %65 = vrot.lane.b32.xlu0 %v1156_v8, %s1083_s0 }
  0x92   :  { %70 = vrot.lane.b32.xlu2 %v1160_v10, %s1082_s12 }
  0x99   :  { %76 = vrot.lane.b32.xlu1 %v1156_v8, %s1084_s1 }
  0x9a   :  { %72 = vrot.lane.b32.xlu2 %v1160_v10, %s1083_s0 }
  0xa2   :  { %181 = vrot.lane.b32.xlu2 %v1160_v10, %s1084_s1 }
  0xec   :  { %v1170_v11 = vpop.permute.xlu2 %70 }
  0xf4   :  { %v1180_v14 = vpop.permute.xlu2 %72 }
  0xfb   :  { %v1172_v12 = vpop.permute.xlu1 %67  ;;  %v1174_v13 = vpop.permute.xlu0 %63 }
  0xfc   :  { %155 = vrot.lane.b32.xlu1 %v1172_v12, %s1084_s1  ;;  %103 = vrot.lane.b32.xlu0 %v1174_v13, %s1084_s1  ;;  %v182_v18 = vpop.permute.xlu2 %181 }
 0x103   :  { %v1182_v15 = vpop.permute.xlu1 %74  ;;  %v1184_v16 = vpop.permute.xlu0 %65 }
 0x104   :  { %233 = vrot.lane.b32.xlu1 %v1180_v14, %s1084_s1  ;;  %129 = vrot.lane.b32.xlu0 %v1184_v16, %s1084_s1  ;;  %v993_v49 = vpack.i.bf16 %v1182_v15, %v1184_v16 }
 0x105   :  { %259 = vrot.lane.b32.xlu2 %v1182_v15, %s1084_s1 }
 0x10b   :  { %v77_v17 = vpop.permute.xlu1 %76 }
 0x10c   :  { %941 = vmatpush.xpose.msk.msra.mxu1 %vm78_vm1, %v77_v17  ;;  %207 = vrot.lane.b32.xlu0 %v1170_v11, %s1084_s1 }
 0x10f   :  { %942 = vmatmul.msk.f32.vlgmr.msra.gmra.mxu1 %vm78_vm1, %v1156_v8 }
 0x15f   :  { %v260_v21 = vpop.permute.xlu2 %259 }
 0x16e   :  { %v156_v19 = vpop.permute.xlu1 %155  ;;  %v104_v20 = vpop.permute.xlu0 %103 }
 0x16f   :  { %943 = vmatpush.xpose.msk.msra.mxu2 %vm78_vm1, %v104_v20  ;;  %947 = vmatpush.xpose.msk.msrb.mxu1 %vm78_vm1, %v156_v19 }
 0x172   :  { %944 = vmatmul.msk.f32.vlgmr.msra.gmra.mxu2 %vm78_vm1, %v1174_v13  ;;  %948 = vmatmul.msk.f32.vlgmr.msrb.gmra.mxu1 %vm78_vm1, %v1172_v12 }
 0x173   :  { %949 = vmatpush.xpose.msk.msrb.mxu2 %vm78_vm1, %v182_v18 }
 0x176   :  { %v234_v22 = vpop.permute.xlu1 %233  ;;  %v130_v23 = vpop.permute.xlu0 %129 }
 0x177   :  { %955 = vmatpush.xpose.msk.msra.mxu2 %vm78_vm1, %v260_v21  ;;  %945 = vmatpush.xpose.msk.msra.mxu3 %vm78_vm1, %v130_v23  ;;  %v988_v23 = vpack.i.bf16 %v1174_v13, %v1172_v12  ;;  %v998_v12 = vpack.i.bf16 %v1180_v14, %v1170_v11 }
 0x178   :  { %953 = vmatpush.xpose.msk.msra.mxu1 %vm78_vm1, %v234_v22 }
 0x17a   :  { %946 = vmatmul.msk.f32.vlgmr.msra.gmra.mxu3 %vm78_vm1, %v1184_v16  ;;  %950 = vmatmul.msk.f32.vlgmr.msrb.gmra.mxu2 %vm78_vm1, %v1160_v10 }
 0x17b   :  { %954 = vmatmul.msk.f32.vlgmr.msra.gmra.mxu1 %vm78_vm1, %v1180_v14 }
 0x17e   :  { %v208_v24 = vpop.permute.xlu0 %207 }
 0x17f   :  { %951 = vmatpush.xpose.msk.msrb.mxu3 %vm78_vm1, %v208_v24 }
 0x182   :  { %952 = vmatmul.msk.f32.vlgmr.msrb.gmra.mxu3 %vm78_vm1, %v1170_v11  ;;  %956 = vmatmul.msk.f32.vlgmr.msra.gmra.mxu2 %vm78_vm1, %v1182_v15 }
 0x18c   :  { %v100_v25 = vpop.f32.mrf.mxu1 }
 0x18d   :  { %v1222_v38 = vmul.f32 0.35355338, %v100_v25 }
 0x18f   :  { %v293_v42 = vsel %vm78_vm1, %v1222_v38, -inf }
 0x1ef   :  { %v178_v26 = vpop.f32.mrf.mxu1 }
 0x1f0   :  { %v288_v27 = vmul.f32 0.35355338, %v178_v26 }
 0x1f2   :  { %v302_v28 = vsel %vm78_vm1, %v288_v27, -inf }
 0x1f3   :  { %303 = vmax.xlane.f32.xlu2 %v302_v28 }
 0x1f5   :  { %v126_v29 = vpop.f32.mrf.mxu2 }
 0x1f6   :  { %v286_v30 = vmul.f32 0.35355338, %v126_v29 }
 0x1f8   :  { %v296_v31 = vsel %vm78_vm1, %v286_v30, -inf  ;;  %v256_v32 = vpop.f32.mrf.mxu1 }
 0x1f9   :  { %297 = vmax.xlane.f32.xlu0 %v296_v31  ;;  %v291_v33 = vmul.f32 0.35355338, %v256_v32 }
 0x1fb   :  { %v311_v36 = vsel %vm78_vm1, %v291_v33, -inf }
 0x1fd   :  { %v152_v34 = vpop.f32.mrf.mxu3  ;;  %v204_v41 = vpop.f32.mrf.mxu2 }
 0x1fe   :  { %v287_v35 = vmul.f32 0.35355338, %v152_v34  ;;  %v1227_v44 = vmul.f32 0.35355338, %v204_v41 }
 0x200   :  { %v299_v37 = vsel %vm78_vm1, %v287_v35, -inf  ;;  %v305_v45 = vsel %vm78_vm1, %v1227_v44, -inf }
 0x201   :  { %312 = vmax.xlane.f32.xlu0 %v311_v36  ;;  %300 = vmax.xlane.f32.xlu1 %v299_v37 }
 0x205   :  { %v230_v39 = vpop.f32.mrf.mxu3  ;;  %v282_v46 = vpop.f32.mrf.mxu2 }
 0x206   :  { %v290_v40 = vmul.f32 0.35355338, %v230_v39  ;;  %v292_v47 = vmul.f32 0.35355338, %v282_v46 }
 0x208   :  { %v308_v43 = vsel %vm78_vm1, %v290_v40, -inf  ;;  %v314_v48 = vsel %vm78_vm1, %v292_v47, -inf }
 0x209   :  { %294 = vmax.xlane.f32.xlu1 %v293_v42  ;;  %309 = vmax.xlane.f32.xlu2 %v308_v43 }
 0x211   :  { %306 = vmax.xlane.f32.xlu2 %v305_v45 }
 0x219   :  { %315 = vmax.xlane.f32.xlu2 %v314_v48 }
 0x231   :  { %994 = vrot.lane.b32.xlu2 %v993_v49, %s1085_s13 }
 0x266   :  { %v304_v50 = vpop.xlane.xlu2 %303 }
 0x267   :  { %v320_v51 = vsub.f32 %v288_v27, %v304_v50 }
 0x269   :  { %v331_v52 = vmul.f32 1.442695, %v320_v51 }
 0x26b   :  { %1009 = vpow2.f32 %v331_v52 }
 0x26c   :  { %v298_v53 = vpop.xlane.xlu0 %297 }
 0x26d   :  { %v318_v54 = vsub.f32 %v286_v30, %v298_v53 }
 0x26f   :  { %v327_v55 = vmul.f32 1.442695, %v318_v54 }
 0x271   :  { %v1235_v56 = vpop.eup %1009  ;;  %1011 = vpow2.f32 %v327_v55 }
 0x272   :  { %v350_v57 = vsel %vm78_vm1, %v1235_v56, 0.0 }
 0x273   :  { %351 = vadd.xlane.f32.xlu0 %v350_v57 }
 0x274   :  { %v301_v58 = vpop.xlane.xlu1 %300  ;;  %v313_v59 = vpop.xlane.xlu0 %312 }
 0x275   :  { %v319_v60 = vsub.f32 %v287_v35, %v301_v58  ;;  %v323_v61 = vsub.f32 %v291_v33, %v313_v59 }
 0x277   :  { %v1239_v62 = vpop.eup %1011  ;;  %v329_v63 = vmul.f32 1.442695, %v319_v60  ;;  %v337_v0 = vmul.f32 1.442695, %v323_v61 }
 0x278   :  { %v344_v1 = vsel %vm78_vm1, %v1239_v62, 0.0 }
 0x279   :  { %1013 = vpow2.f32 %v329_v63  ;;  %345 = vadd.xlane.f32.xlu1 %v344_v1 }
 0x27a   :  { %1015 = vpow2.f32 %v337_v0 }
 0x27c   :  { %v310_v2 = vpop.xlane.xlu2 %309  ;;  %v295_v28 = vpop.xlane.xlu1 %294 }
 0x27d   :  { %v322_v3 = vsub.f32 %v290_v40, %v310_v2  ;;  %v317_v29 = vsub.f32 %v1222_v38, %v295_v28 }
 0x27f   :  { %v1014_v6 = vpop.eup %1013  ;;  %v335_v7 = vmul.f32 1.442695, %v322_v3  ;;  %v325_v13 = vmul.f32 1.442695, %v317_v29 }
 0x280   :  { %v1243_v9 = vpop.eup %1015  ;;  %v347_v15 = vsel %vm78_vm1, %v1014_v6, 0.0 }
 0x281   :  { %348 = vadd.xlane.f32.xlu2 %v347_v15  ;;  %v359_v16 = vsel %vm78_vm1, %v1243_v9, 0.0  ;;  %1017 = vpow2.f32 %v335_v7 }
 0x282   :  { %360 = vadd.xlane.f32.xlu0 %v359_v16 }
 0x284   :  { %v307_v17 = vpop.xlane.xlu2 %306 }
 0x285   :  { %v321_v32 = vsub.f32 %v1227_v44, %v307_v17 }
 0x287   :  { %v1248_v18 = vpop.eup %1017 }
 0x288   :  { %v356_v19 = vsel %vm78_vm1, %v1248_v18, 0.0 }
 0x289   :  { %357 = vadd.xlane.f32.xlu2 %v356_v19 }
 0x28c   :  { %v316_v20 = vpop.xlane.xlu2 %315 }
 0x28d   :  { %v324_v21 = vsub.f32 %v292_v47, %v316_v20 }
 0x28f   :  { %v339_v22 = vmul.f32 1.442695, %v324_v21 }
 0x291   :  { %1019 = vpow2.f32 %v339_v22 }
 0x292   :  { %989 = vrot.lane.b32.xlu1 %v988_v23, %s1085_s13  ;;  %1021 = vpow2.f32 %v325_v13 }
 0x294   :  { %v995_v24 = vpop.permute.xlu2 %994 }
 0x295   :  { %v996_v25 = vunpack.i.l.bf16 %v995_v24  ;;  %v997_v47 = vunpack.i.h.bf16 %v995_v24 }
 0x297   :  { %v1020_v26 = vpop.eup %1019  ;;  %454 = vmatpush.msrb.mxu1 %v996_v25 }
 0x298   :  { %v362_v27 = vsel %vm78_vm1, %v1020_v26, 0.0  ;;  %v1022_v30 = vpop.eup %1021 }
 0x299   :  { %363 = vadd.xlane.f32.xlu0 %v362_v27  ;;  %v341_v31 = vsel %vm78_vm1, %v1022_v30, 0.0 }
 0x2a1   :  { %381 = vrot.lane.b32.xlu2 %v1156_v8, %s1085_s13  ;;  %v333_v8 = vmul.f32 1.442695, %v321_v32 }
 0x2a3   :  { %1023 = vpow2.f32 %v333_v8 }
 0x2a9   :  { %485 = vrot.lane.b32.xlu2 %v1160_v10, %s1085_s13  ;;  %v1024_v33 = vpop.eup %1023 }
 0x2aa   :  { %v353_v34 = vsel %vm78_vm1, %v1024_v33, 0.0 }
 0x2ad   :  { %999 = vrot.lane.b32.xlu0 %v998_v12, %s1085_s13 }
 0x2bc   :  { %342 = vadd.xlane.f32.xlu1 %v341_v31  ;;  %v1089_v31 = vmov 32.0  }
 0x2d7   :  { %354 = vadd.xlane.f32.xlu0 %v353_v34 }
 0x2e6   :  { %v352_v35 = vpop.xlane.xlu0 %351 }
 0x2ec   :  { %v346_v11 = vpop.xlane.xlu1 %345 }
 0x2f4   :  { %v349_v10 = vpop.xlane.xlu2 %348 }
 0x2f5   :  { %1025 = vrcp.f32 %v349_v10  ;;  %v361_v40 = vpop.xlane.xlu0 %360 }
 0x2f6   :  { %1027 = vrcp.f32 %v352_v35 }
 0x2f7   :  { %1029 = vrcp.f32 %v346_v11 }
 0x2fb   :  { %v1026_v14 = vpop.eup %1025 }
 0x2fc   :  { %v375_v36 = vmul.f32 %v1026_v14, %v1014_v6  ;;  %v358_v37 = vpop.xlane.xlu2 %357  ;;  %v1028_v38 = vpop.eup %1027 }
 0x2fd   :  { %v1030_v39 = vpop.eup %1029  ;;  %v376_v45 = vmul.f32 %v1028_v38, %v1235_v56 }
 0x2fe   :  { %959 = vmatmul.msk.f32.vlgmr.msrb.gmra.mxu1 %vm78_vm1, %v375_v36  ;;  %v374_v46 = vmul.f32 %v1030_v39, %v1239_v62 }
 0x304   :  { %v990_v41 = vpop.permute.xlu1 %989  ;;  %v382_v42 = vpop.permute.xlu2 %381 }
 0x305   :  { %v991_v43 = vunpack.i.l.bf16 %v990_v41  ;;  %v992_v44 = vunpack.i.h.bf16 %v990_v41  ;;  %402 = vmatpush.msra.mxu3 %v382_v42  ;;  %v685_v42 = vld [vmem:[%s1371_s3 + $0x18] sm:$0xff] }
 0x307   :  { %428 = vmatpush.msrb.mxu0 %v992_v44  ;;  %480 = vmatpush.msrb.mxu2 %v991_v43  ;;  %v684_v43 = vld [vmem:[%s1371_s3 + $0x10] sm:$0xff]  ;;  %v683_v44 = vld [vmem:[%s1371_s3 + $0x8] sm:$0xff] }
 0x308   :  { %958 = vmatmul.msk.f32.vlgmr.msrb.gmra.mxu0 %vm78_vm1, %v374_v46  ;;  %960 = vmatmul.msk.f32.vlgmr.msrb.gmra.mxu2 %vm78_vm1, %v376_v45  ;;  %v682_v45 = vld [vmem:[%s1371_s3] sm:$0xff] }
 0x309   :  { %584 = vmatpush.msra.mxu2 %v997_v47 }
 0x30c   :  { %v364_v48 = vpop.xlane.xlu0 %363  ;;  %v486_v49 = vpop.permute.xlu2 %485 }
 0x30d   :  { %1031 = vrcp.f32 %v364_v48  ;;  %506 = vmatpush.msrb.mxu3 %v486_v49 }
 0x30e   :  { %1033 = vrcp.f32 %v361_v40 }
 0x30f   :  { %1035 = vrcp.f32 %v358_v37 }
 0x313   :  { %v1032_v50 = vpop.eup %1031 }
 0x314   :  { %v380_v51 = vmul.f32 %v1032_v50, %v1020_v26  ;;  %v1034_v52 = vpop.eup %1033 }
 0x315   :  { %v1036_v53 = vpop.eup %1035  ;;  %v379_v57 = vmul.f32 %v1034_v52, %v1243_v9 }
 0x316   :  { %964 = vmatmul.msk.f32.vlgmr.msra.gmra.mxu2 %vm78_vm1, %v380_v51  ;;  %v378_v58 = vmul.f32 %v1036_v53, %v1248_v18 }
 0x31f   :  { %v1000_v54 = vpop.permute.xlu0 %999 }
 0x320   :  { %v1002_v55 = vunpack.i.h.bf16 %v1000_v54  ;;  %v1001_v56 = vunpack.i.l.bf16 %v1000_v54  ;;  %v722_v54 = vld [vmem:[%s1372_s4 + $0x18] sm:$0xff] }
 0x322   :  { %532 = vmatpush.msra.mxu0 %v1001_v56  ;;  %558 = vmatpush.msra.mxu1 %v1002_v55  ;;  %v1004_v56 = vld [vmem:[%s1370_s2] ss:$0 sm:$0xff] }
 0x323   :  { %962 = vmatmul.msk.f32.vlgmr.msra.gmra.mxu0 %vm78_vm1, %v378_v58  ;;  %963 = vmatmul.msk.f32.vlgmr.msra.gmra.mxu1 %vm78_vm1, %v379_v57 }
 0x324   :  { %743 = vmatpush.msrb.mxu0 %v722_v54 }
 0x32f   :  { %v343_v59 = vpop.xlane.xlu1 %342 }
 0x330   :  { %1037 = vrcp.f32 %v343_v59 }
 0x336   :  { %v1038_v60 = vpop.eup %1037 }
 0x337   :  { %v373_v61 = vmul.f32 %v1038_v60, %v1022_v30 }
 0x339   :  { %957 = vmatmul.msk.f32.vlgmr.msra.gmra.mxu3 %vm78_vm1, %v373_v61  ;;  %v1005_v61 = vld [vmem:[%s1370_s2 + $0x1] ss:$0 sm:$0xff] }
 0x33a   :  { %706 = vmatpush.msra.mxu3 %v685_v42 }
 0x33c   :  { %707 = vmatpush.msra.mxu3 %v684_v43 }
 0x33e   :  { %708 = vmatpush.msra.mxu3 %v683_v44 }
 0x340   :  { %709 = vmatpush.msra.mxu3 %v682_v45 }
 0x34a   :  { %v355_v62 = vpop.xlane.xlu0 %354 }
 0x34b   :  { %1039 = vrcp.f32 %v355_v62 }
 0x34c   :  { %1041 = vrcp.f32 %v1089_v31  ;;  %v1007_v31 = vld [vmem:[%s1372_s4 + $0x20] ss:$0 sm:$0xff] }
 0x351   :  { %v1040_v63 = vpop.eup %1039 }
 0x352   :  { %v377_v0 = vmul.f32 %v1040_v63, %v1024_v33 }
 0x354   :  { %961 = vmatmul.msk.f32.vlgmr.msrb.gmra.mxu3 %vm78_vm1, %v377_v0 }
 0x37b   :  { %v456_v3 = vpop.f32.mrf.mxu1 }
 0x385   :  { %v430_v1 = vpop.f32.mrf.mxu0 }
 0x386   :  { %590 = vrot.lane.b32.xlu2 %v430_v1, %s1086_s14 }
 0x38b   :  { %v482_v2 = vpop.f32.mrf.mxu2 }
 0x38c   :  { %598 = vrot.lane.b32.xlu1 %v482_v2, %s1087_s15 }
 0x38e   :  { %594 = vrot.lane.b32.xlu2 %v456_v3, %s1088_s16 }
 0x399   :  { %v586_v9 = vpop.f32.mrf.mxu2 }
 0x3a0   :  { %v534_v6 = vpop.f32.mrf.mxu0  ;;  %v560_v7 = vpop.f32.mrf.mxu1 }
 0x3a1   :  { %611 = vrot.lane.b32.xlu0 %v560_v7, %s1088_s16  ;;  %607 = vrot.lane.b32.xlu2 %v534_v6, %s1086_s14 }
 0x3a9   :  { %615 = vrot.lane.b32.xlu2 %v586_v9, %s1087_s15 }
 0x3bc   :  { %v404_v17 = vpop.f32.mrf.mxu3 }
 0x3d7   :  { %v508_v25 = vpop.f32.mrf.mxu3 }
 0x3e0   :  { %v591_v15 = vpop.permute.xlu2 %590 }
 0x3e1   :  { %v601_v18 = vsel %vm78_vm1, %v404_v17, %v591_v15 }
 0x3e8   :  { %v595_v16 = vpop.permute.xlu2 %594 }
 0x3e9   :  { %v603_v19 = vsel %vm602_vm2, %v601_v18, %v595_v16 }
 0x3fb   :  { %v608_v24 = vpop.permute.xlu2 %607 }
 0x3fc   :  { %v618_v26 = vsel %vm78_vm1, %v508_v25, %v608_v24  ;;  %v1006_v24 = vld [vmem:[%s1371_s3 + $0x20] ss:$0 sm:$0xff] }
 0x3fe   :  { %v599_v20 = vpop.permute.xlu1 %598 }
 0x3ff   :  { %v605_v21 = vsel %vm604_vm3, %v603_v19, %v599_v20  ;;  %v721_v19 = vld [vmem:[%s1372_s4 + $0x10] sm:$0xff]  ;;  %v720_v20 = vld [vmem:[%s1372_s4 + $0x8] sm:$0xff] }
 0x400   :  { %v621_v22 = vadd.f32 %v605_v21, %v1142_v4  ;;  %v1042_v4 = vpop.eup %1041  ;;  %744 = vmatpush.msrb.mxu0 %v721_v19  ;;  %v719_v21 = vld [vmem:[%s1372_s4] sm:$0xff]  ;;  %s1090_s4 = smov [#allocation2]  }
 0x401   :  { %v630_v32 = vmul.f32 32.0, %v1042_v4  ;;  %vm634_vm4 = vweird.f32 %v1042_v4 }
 0x402   :  { %v623_v23 = vsel %vm32_vm0, %v621_v22, 0.0  ;;  %745 = vmatpush.msrb.mxu0 %v720_v20 }
 0x403   :  { %624 = vadd.xlane.f32.xlu2 %v623_v23  ;;  %v616_v28 = vpop.permute.xlu2 %615  ;;  %v631_v8 = vsub.f32 1.0, %v630_v32  ;;  %v756_v23 = vld [vmem:[%s1373_s5 + $0x10] sm:$0xff] }
 0x404   :  { %746 = vmatpush.msrb.mxu0 %v719_v21 }
 0x405   :  { %v632_v33 = vmul.f32 %v1042_v4, %v631_v8 }
 0x407   :  { %v633_v34 = vadd.f32 %v1042_v4, %v632_v33 }
 0x409   :  { %v635_v10 = vsel %vm634_vm4, %v1042_v4, %v633_v34  ;;  %v1008_v34 = vld [vmem:[%s1373_s5 + $0x20] ss:$0 sm:$0xff] }
 0x413   :  { %v612_v27 = vpop.permute.xlu0 %611 }
 0x414   :  { %v619_v29 = vsel %vm602_vm2, %v618_v26, %v612_v27 }
 0x415   :  { %v620_v12 = vsel %vm604_vm3, %v619_v29, %v616_v28 }
 0x416   :  { %v622_v13 = vadd.f32 %v620_v12, %v1149_v5 }
 0x418   :  { %v626_v30 = vsel %vm32_vm0, %v622_v13, 0.0 }
 0x419   :  { %627 = vadd.xlane.f32.xlu1 %v626_v30  ;;  %v754_v30 = vld [vmem:[%s1373_s5] sm:$0xff] }
 0x476   :  { %v625_v35 = vpop.xlane.xlu2 %624 }
 0x477   :  { %v636_v11 = vmul.f32 %v635_v10, %v625_v35 }
 0x479   :  { %v638_v14 = vsub.f32 %v621_v22, %v636_v11  ;;  %v757_v22 = vld [vmem:[%s1373_s5 + $0x18] sm:$0xff] }
 0x47a   :  { %778 = vmatpush.msrb.mxu1 %v757_v22 }
 0x47b   :  { %v640_v36 = vmul.f32 %v638_v14, %v638_v14 }
 0x47c   :  { %779 = vmatpush.msrb.mxu1 %v756_v23 }
 0x47d   :  { %v642_v37 = vsel %vm32_vm0, %v640_v36, 0.0 }
 0x47e   :  { %643 = vadd.xlane.f32.xlu0 %v642_v37 }
 0x48c   :  { %v628_v5 = vpop.xlane.xlu1 %627 }
 0x48d   :  { %v637_v38 = vmul.f32 %v635_v10, %v628_v5 }
 0x48f   :  { %v639_v39 = vsub.f32 %v622_v13, %v637_v38  ;;  %v755_v13 = vld [vmem:[%s1373_s5 + $0x8] sm:$0xff]  ;;  %s925_s5 = sshll.u32 %s1090_s4, 4  ;;  %s926_s5 = int_to_ptr.vmem [resolvable:$true] %s925_s5 }
 0x490   :  { %780 = vmatpush.msrb.mxu1 %v755_v13 }
 0x491   :  { %v641_v40 = vmul.f32 %v639_v39, %v639_v39 }
 0x492   :  { %781 = vmatpush.msrb.mxu1 %v754_v30 }
 0x493   :  { %v645_v41 = vsel %vm32_vm0, %v641_v40, 0.0 }
 0x494   :  { %646 = vadd.xlane.f32.xlu2 %v645_v41 }
 0x4f1   :  { %v644_v46 = vpop.xlane.xlu0 %643 }
 0x4f2   :  { %v648_v47 = vmul.f32 %v644_v46, %v635_v10 }
 0x4f4   :  { %v650_v48 = vadd.f32 1e-05, %v648_v47 }
 0x4f6   :  { %1043 = vrsqrt.f32 %v650_v48  ;;  %vm658_vm6 = vweird.f32 %v650_v48 }
 0x4fc   :  { %v1044_v49 = vpop.eup %1043 }
 0x4fd   :  { %v653_v50 = vmul.f32 %v1044_v49, %v650_v48  ;;  %vm659_vm5 = vweird.f32 %v1044_v49 }
 0x4fe   :  { %vm660_vm7 = vmor %vm658_vm6, %vm659_vm5 }
 0x4ff   :  { %v654_v51 = vmul.f32 %v1044_v49, %v653_v50 }
 0x501   :  { %v655_v52 = vmul.f32 0.5, %v654_v51 }
 0x503   :  { %v656_v53 = vsub.f32 1.5, %v655_v52 }
 0x505   :  { %v657_v55 = vmul.f32 %v1044_v49, %v656_v53 }
 0x507   :  { %v661_v57 = vsel %vm660_vm7, %v1044_v49, %v657_v55  ;;  %v647_v58 = vpop.xlane.xlu2 %646 }
 0x508   :  { %v672_v59 = vmul.f32 %v661_v57, %v638_v14  ;;  %v649_v60 = vmul.f32 %v647_v58, %v635_v10 }
 0x50a   :  { %v676_v62 = vmul.f32 %v1004_v56, %v672_v59  ;;  %v651_v63 = vadd.f32 1e-05, %v649_v60 }
 0x50c   :  { %1045 = vrsqrt.f32 %v651_v63  ;;  %v680_v0 = vadd.f32 %v1005_v61, %v676_v62  ;;  %vm668_vm9 = vweird.f32 %v651_v63 }
 0x50e   :  { %965 = vmatmul.msk.f32.vlgmr.msra.gmra.mxu3 %vm32_vm0, %v680_v0 }
 0x512   :  { %v1046_v1 = vpop.eup %1045 }
 0x513   :  { %v663_v2 = vmul.f32 %v1046_v1, %v651_v63  ;;  %vm669_vm8 = vweird.f32 %v1046_v1 }
 0x514   :  { %vm670_vm10 = vmor %vm668_vm9, %vm669_vm8 }
 0x515   :  { %v664_v3 = vmul.f32 %v1046_v1, %v663_v2 }
 0x517   :  { %v665_v6 = vmul.f32 0.5, %v664_v3 }
 0x519   :  { %v666_v7 = vsub.f32 1.5, %v665_v6 }
 0x51b   :  { %v667_v9 = vmul.f32 %v1046_v1, %v666_v7 }
 0x51d   :  { %v671_v15 = vsel %vm670_vm10, %v1046_v1, %v667_v9 }
 0x51e   :  { %v673_v16 = vmul.f32 %v671_v15, %v639_v39 }
 0x520   :  { %v677_v17 = vmul.f32 %v1004_v56, %v673_v16 }
 0x522   :  { %v681_v18 = vadd.f32 %v1005_v61, %v677_v17 }
 0x524   :  { %966 = vmatmul.msk.f32.gmra.mxu3 %vm32_vm0, %v681_v18 }
 0x591   :  { %v711_v25 = vpop.f32.mrf.mxu3 }
 0x592   :  { %v712_v26 = vadd.f32 %v1006_v24, %v711_v25 }
 0x594   :  { %v717_v27 = vmax.f32 %v712_v26, 0.0 }
 0x596   :  { %967 = vmatmul.msk.f32.vlgmr.msrb.gmra.mxu0 %vm32_vm0, %v717_v27 }
 0x5a7   :  { %v714_v28 = vpop.f32.mrf.mxu3 }
 0x5a8   :  { %v715_v29 = vadd.f32 %v1006_v24, %v714_v28 }
 0x5aa   :  { %v718_v12 = vmax.f32 %v715_v29, 0.0 }
 0x5ac   :  { %968 = vmatmul.msk.f32.gmra.mxu0 %vm32_vm0, %v718_v12 }
 0x613   :  { %v748_v4 = vpop.f32.mrf.mxu0 }
 0x614   :  { %v749_v32 = vadd.f32 %v1007_v31, %v748_v4 }
 0x616   :  { %969 = vmatmul.msk.f32.vlgmr.msrb.gmra.mxu1 %vm32_vm0, %v749_v32 }
 0x629   :  { %v751_v8 = vpop.f32.mrf.mxu0 }
 0x62a   :  { %v752_v33 = vadd.f32 %v1007_v31, %v751_v8 }
 0x62c   :  { %970 = vmatmul.msk.f32.gmra.mxu1 %vm32_vm0, %v752_v33 }
 0x693   :  { %v783_v10 = vpop.f32.mrf.mxu1 }
 0x694   :  { %v784_v35 = vadd.f32 %v1008_v34, %v783_v10 }
 0x696   :  { %790 = vrot.lane.b32.xlu1 %v784_v35, %s1084_s1 }
 0x6a9   :  { %v786_v11 = vpop.f32.mrf.mxu1 }
 0x6aa   :  { %v787_v14 = vadd.f32 %v1008_v34, %v786_v11 }
 0x6ac   :  { %817 = vrot.lane.b32.xlu2 %v787_v14, %s1084_s1 }
 0x6b4   :  { %867 = vrot.lane.b32.xlu2 %v784_v35, %s1085_s13 }
 0x706   :  { %v818_v36 = vpop.permute.xlu2 %817 }
 0x708   :  { %v791_v37 = vpop.permute.xlu1 %790 }
 0x709   :  { %971 = vmatpush.xpose.msk.msrb.mxu2 %vm32_vm0, %v791_v37 }
 0x70c   :  { %972 = vmatmul.msk.f32.vlgmr.msrb.gmra.mxu2 %vm32_vm0, %v784_v35 }
 0x70d   :  { %973 = vmatpush.xpose.msk.msra.mxu2 %vm32_vm0, %v818_v36 }
 0x70e   :  { %v868_v5 = vpop.permute.xlu2 %867 }
 0x70f   :  { %888 = vmatpush.msrb.mxu3 %v868_v5 }
 0x714   :  { %974 = vmatmul.msk.f32.vlgmr.msra.gmra.mxu2 %vm32_vm0, %v787_v14 }
 0x78f   :  { %v813_v38 = vpop.f32.mrf.mxu2 }
 0x790   :  { %v843_v39 = vmul.f32 0.17677669, %v813_v38 }
 0x792   :  { %v845_v40 = vsel %vm78_vm1, %v843_v39, -inf }
 0x793   :  { %846 = vmax.xlane.f32.xlu0 %v845_v40 }
 0x797   :  { %v840_v41 = vpop.f32.mrf.mxu2 }
 0x798   :  { %v844_v42 = vmul.f32 0.17677669, %v840_v41 }
 0x79a   :  { %v848_v43 = vsel %vm78_vm1, %v844_v42, -inf }
 0x79b   :  { %849 = vmax.xlane.f32.xlu0 %v848_v43 }
 0x806   :  { %v847_v44 = vpop.xlane.xlu0 %846 }
 0x807   :  { %v851_v45 = vsub.f32 %v843_v39, %v847_v44 }
 0x809   :  { %v853_v46 = vmul.f32 1.442695, %v851_v45 }
 0x80b   :  { %1047 = vpow2.f32 %v853_v46 }
 0x80e   :  { %v850_v47 = vpop.xlane.xlu0 %849 }
 0x80f   :  { %v852_v48 = vsub.f32 %v844_v42, %v850_v47 }
 0x811   :  { %v1048_v49 = vpop.eup %1047  ;;  %v855_v50 = vmul.f32 1.442695, %v852_v48 }
 0x812   :  { %v857_v51 = vsel %vm78_vm1, %v1048_v49, 0.0 }
 0x813   :  { %1049 = vpow2.f32 %v855_v50  ;;  %858 = vadd.xlane.f32.xlu0 %v857_v51 }
 0x819   :  { %v1050_v52 = vpop.eup %1049 }
 0x81a   :  { %v860_v53 = vsel %vm78_vm1, %v1050_v52, 0.0 }
 0x81b   :  { %861 = vadd.xlane.f32.xlu1 %v860_v53 }
 0x827   :  { %893 = vrot.lane.b32.xlu0 %v787_v14, %s1085_s13 }
 0x886   :  { %v859_v54 = vpop.xlane.xlu0 %858 }
 0x887   :  { %1051 = vrcp.f32 %v859_v54 }
 0x88d   :  { %v1052_v55 = vpop.eup %1051 }
 0x88e   :  { %v865_v56 = vmul.f32 %v1052_v55, %v1048_v49  ;;  %v862_v57 = vpop.xlane.xlu1 %861 }
 0x88f   :  { %1053 = vrcp.f32 %v862_v57 }
 0x890   :  { %975 = vmatmul.msk.f32.vlgmr.msrb.gmra.mxu3 %vm78_vm1, %v865_v56 }
 0x895   :  { %v1054_v58 = vpop.eup %1053 }
 0x896   :  { %v866_v59 = vmul.f32 %v1054_v58, %v1050_v52 }
 0x899   :  { %v894_v60 = vpop.permute.xlu0 %893 }
 0x89a   :  { %914 = vmatpush.msra.mxu0 %v894_v60 }
 0x89b   :  { %976 = vmatmul.msk.f32.vlgmr.msra.gmra.mxu0 %vm78_vm1, %v866_v59 }
 0x913   :  { %v890_v61 = vpop.f32.mrf.mxu3 }
 0x914   :  { %919 = vst.msk [vmem:[#allocation2] sm:$0xff] %vm32_vm0, %v890_v61 }
 0x918   :  { %v916_v62 = vpop.f32.mrf.mxu0 }
 0x919   :  { %920 = vst.msk [vmem:[#allocation2 + $0x8] sm:$0xff] %vm32_vm0, %v916_v62 }
 0x91a   :  { %933 = dma.vmem_to_hbm [thread:$0]  %s926_s5, 256, %s928_s26, [#allocation3], %s1091_s27, %s1091_s27, %s1086_s14  }
 0x91b   :  { %1079 = dma.done.wait [#allocation3], 256  }
 0x91c   :  { %1080 = vsyncadd [#allocation3], 4294967040 }
 0x91d   :  { %938 = vsyncpa [#allocation3], 1 }

</bundles_post_ra>
